<compile_context>
chip_gen: v7x
topology: tpu7x:2x2x1
jax: 0.10.0
libtpu: 0.0.40
codegen_flags: <defaults>
</compile_context>

<pallas_src>
import jax
import jax.numpy as jnp
from jax.experimental import pallas as pl
from jax.experimental.pallas import tpu as pltpu


# ---------------------------------------------------------------- kernels ---

def _mpu_kernel(u_ref, p_ref, w_ref, b_ref, o_ref):
    # u_ref, p_ref: [TN, fea] row tiles.  w_ref: [2*fea, filt] resident.
    # b_ref: [1, filt] resident.  o_ref: [TN, fea].
    u_relu = jnp.maximum(u_ref[...], 0.0)
    p_relu = jnp.maximum(p_ref[...], 0.0)
    cat = jnp.concatenate([u_relu, p_relu], axis=-1)          # lane concat (XLU)
    logits = jnp.dot(cat.astype(w_ref.dtype), w_ref[...],
                     preferred_element_type=jnp.float32) + b_ref[...]
    gate = jax.nn.sigmoid(logits)                              # EUP
    gate_mean = jnp.sum(gate, axis=1, keepdims=True) * (1.0 / logits.shape[1])
    o_ref[...] = (p_ref[...] * gate_mean).astype(o_ref.dtype)  # scale un-relu'd pair


def _mpu_kernel_unary_bcast(p_ref, wp_ref, ubias_ref, o_ref):
    # Broadcast-unary path: relu(u0) @ Wu^T + b was folded into ubias_ref
    # ([1, filt]) outside the kernel -> the N x fea unary broadcast is never
    # streamed from HBM.
    p_relu = jnp.maximum(p_ref[...], 0.0)
    logits = jnp.dot(p_relu.astype(wp_ref.dtype), wp_ref[...],
                     preferred_element_type=jnp.float32) + ubias_ref[...]
    gate = jax.nn.sigmoid(logits)
    gate_mean = jnp.sum(gate, axis=1, keepdims=True) * (1.0 / logits.shape[1])
    o_ref[...] = (p_ref[...] * gate_mean).astype(o_ref.dtype)


def _mpu_kernel_pair_bcast(u_ref, wu_ref, pbias_ref, p0_ref, o_ref):
    # Broadcast-pair path: relu(p0) @ Wp^T + b folded into pbias_ref; only
    # unary is streamed, and the single pair row (p0_ref, [1, fea]) stays
    # VMEM-resident for the final scale.
    u_relu = jnp.maximum(u_ref[...], 0.0)
    logits = jnp.dot(u_relu.astype(wu_ref.dtype), wu_ref[...],
                     preferred_element_type=jnp.float32) + pbias_ref[...]
    gate = jax.nn.sigmoid(logits)
    gate_mean = jnp.sum(gate, axis=1, keepdims=True) * (1.0 / logits.shape[1])
    o_ref[...] = (gate_mean * p0_ref[...]).astype(o_ref.dtype)


# ---------------------------------------------------------------- wrapper ---

_TARGET_TILE = 2048  # rows/step; [2048,32] f32 lane-pads to 1 MiB -> ~6-7 MiB
                     # total with double-buffering: fits default scoped VMEM on
                     # v5e (16 MiB), v6e (32 MiB) and v7x (32 MiB).


def _round_up(x, m):
    return ((x + m - 1) // m) * m


def _pick_tile(n):
    # Aim for >= 4 grid steps when N is large (v7x: 2 TCs share HBM, so the
    # "parallel" axis needs enough steps to shard), but never fragment tiny N.
    tn = _round_up(max(1, -(-n // 4)), 8)   # sublane multiple of 8
    tn = min(tn, _TARGET_TILE)
    return max(tn, 8)


def message_passing_unit_v1(unary_term, pair_term, W, b, *, use_bf16_matmul=False):
    """unary_term: [Nu, fea], pair_term: [Np, fea], W: [filter, 2*fea], b: [filter]."""
    fea = pair_term.shape[1]
    filt = W.shape[0]
    out_dtype = pair_term.dtype
    w_dtype = jnp.bfloat16 if use_bf16_matmul else jnp.float32

    # Weight prep (tiny; could be hoisted to init time by the caller).
    Wu_T = jnp.transpose(W[:, :fea])          # [fea, filt]
    Wp_T = jnp.transpose(W[:, fea:])          # [fea, filt]
    W_T = jnp.transpose(W)                    # [2*fea, filt]
    b2 = b.reshape(1, filt).astype(jnp.float32)

    unary_bcast = unary_term.shape[0] == 1 and pair_term.shape[0] > 1
    pair_bcast = unary_term.shape[0] > 1 and pair_term.shape[0] == 1

    N = unary_term.shape[0] if pair_bcast else pair_term.shape[0]
    TN = _pick_tile(N)
    grid = (pl.cdiv(N, TN),)                  # partial final block handled by Pallas

    row_spec = pl.BlockSpec((TN, fea), lambda i: (i, 0))
    b_spec = pl.BlockSpec((1, filt), lambda i: (0, 0))      # VMEM-resident
    cparams = pltpu.CompilerParams(dimension_semantics=("parallel",))
    out_shape = jax.ShapeDtypeStruct((N, fea), out_dtype)

    cost = pl.CostEstimate(
        flops=2 * N * (2 * fea) * filt,
        transcendentals=N * filt,
        bytes_accessed=(3 * N * fea + 2 * fea * filt + filt) * 4,
    )

    if unary_bcast:
        ubias = jnp.maximum(unary_term, 0.0) @ Wu_T + b2    # [1, filt], f32
        out = pl.pallas_call(
            _mpu_kernel_unary_bcast,
            out_shape=out_shape,
            grid=grid,
            in_specs=[row_spec,
                      pl.BlockSpec((fea, filt), lambda i: (0, 0)),
                      b_spec],
            out_specs=row_spec,
            compiler_params=cparams,
            cost_estimate=cost,
        )(pair_term, Wp_T.astype(w_dtype), ubias)
    elif pair_bcast:
        pbias = jnp.maximum(pair_term, 0.0) @ Wp_T + b2     # [1, filt], f32
        out = pl.pallas_call(
            _mpu_kernel_pair_bcast,
            out_shape=out_shape,
            grid=grid,
            in_specs=[row_spec,
                      pl.BlockSpec((fea, filt), lambda i: (0, 0)),
                      b_spec,
                      pl.BlockSpec((1, fea), lambda i: (0, 0))],
            out_specs=row_spec,
            compiler_params=cparams,
            cost_estimate=cost,
        )(unary_term, Wu_T.astype(w_dtype), pbias, pair_term)
    else:
        out = pl.pallas_call(
            _mpu_kernel,
            out_shape=out_shape,
            grid=grid,
            in_specs=[row_spec, row_spec,
                      pl.BlockSpec((2 * fea, filt), lambda i: (0, 0)),
                      b_spec],
            out_specs=row_spec,
            compiler_params=cparams,
            cost_estimate=cost,
        )(unary_term, pair_term, W_T.astype(w_dtype), b2)

    return out


# -------------------------------------------------------------- reference ---

def _reference(unary_term, pair_term, W, b):
    fea = pair_term.shape[1]
    if unary_term.shape[0] == 1 and pair_term.shape[0] > 1:
        unary_term = jnp.broadcast_to(unary_term, (pair_term.shape[0], fea))
    if unary_term.shape[0] > 1 and pair_term.shape[0] == 1:
        pair_term = jnp.broadcast_to(pair_term, (unary_term.shape[0], fea))
    gate = jnp.concatenate([unary_term, pair_term], axis=1)
    gate = jnp.maximum(gate, 0.0)
    gate = jax.nn.sigmoid(gate @ W.T + b).mean(axis=1)
    return pair_term * gate[:, None]


if __name__ == "__main__":
    fea_size = 32
    filter_size = 128

    key = jax.random.PRNGKey(0)
    k_u, k_p, k_w, k_b = jax.random.split(key, 4)

    # Deterministic nn.Linear-style init: U(-bound, bound), bound = 1/sqrt(fan_in).
    fan_in = fea_size * 2
    bound = 1.0 / (fan_in ** 0.5)
    W = jax.random.uniform(k_w, (filter_size, fan_in), jnp.float32, -bound, bound)
    b = jax.random.uniform(k_b, (filter_size,), jnp.float32, -bound, bound)

    # Path 1: equal batch sizes (small harness shape).
    N = 8
    unary = jax.random.normal(k_u, (N, fea_size), dtype=jnp.float32)
    pair = jax.random.normal(k_p, (N, fea_size), dtype=jnp.float32)
    out = message_passing_unit_v1(unary, pair, W, b)
    jax.block_until_ready(out)
    ref = _reference(unary, pair, W, b)
    assert out.shape == (N, fea_size)
    assert jnp.allclose(out, ref, atol=1e-5, rtol=1e-5), "mismatch (equal batch)"

    # Path 2: broadcast-unary (.expand path) — broadcast never materialized.
    out_b = message_passing_unit_v1(unary[:1], pair, W, b)
    jax.block_until_ready(out_b)
    ref_b = _reference(unary[:1], pair, W, b)
    assert jnp.allclose(out_b, ref_b, atol=1e-5, rtol=1e-5), "mismatch (bcast unary)"

    # Path 3: broadcast-pair (.expand path) — broadcast never materialized.
    out_c = message_passing_unit_v1(unary, pair[:1], W, b)
    jax.block_until_ready(out_c)
    ref_c = _reference(unary, pair[:1], W, b)
    assert jnp.allclose(out_c, ref_c, atol=1e-5, rtol=1e-5), "mismatch (bcast pair)"

    # Path 4: ragged N exercising the partial final block (no pad, no slice).
    N2 = 200
    unary2 = jax.random.normal(jax.random.PRNGKey(1), (N2, fea_size), dtype=jnp.float32)
    pair2 = jax.random.normal(jax.random.PRNGKey(2), (N2, fea_size), dtype=jnp.float32)
    out2 = message_passing_unit_v1(unary2, pair2, W, b)
    jax.block_until_ready(out2)
    ref2 = _reference(unary2, pair2, W, b)
    assert out2.shape == (N2, fea_size)
    assert jnp.allclose(out2, ref2, atol=1e-5, rtol=1e-5), "mismatch (ragged N)"

    # Path 5: bf16 MXU inputs with f32 accumulation (v5e lever) — looser tol.
    out3 = message_passing_unit_v1(unary2, pair2, W, b, use_bf16_matmul=True)
    jax.block_until_ready(out3)
    assert jnp.allclose(out3, ref2, atol=1e-2, rtol=1e-2), "mismatch (bf16 matmul)"

    print("KERNEL_OK")
</pallas_src>

<mosaic_0001>
module attributes {stable_mosaic.version = 11 : i64} {
  func.func @_mpu_kernel(%arg0: i32, %arg1: memref<8x32xf32, #tpu.memory_space<vmem>>, %arg2: memref<8x32xf32, #tpu.memory_space<vmem>>, %arg3: memref<64x128xf32, #tpu.memory_space<vmem>>, %arg4: memref<1x128xf32, #tpu.memory_space<vmem>>, %arg5: memref<8x32xf32, #tpu.memory_space<vmem>>) attributes {dimension_semantics = [#tpu.dimension_semantics<parallel>], iteration_bounds = array<i64: 1>, scalar_prefetch = 0 : i64, scratch_operands = 0 : i64, tpu.core_type = #tpu.core_type<tc>, window_params = [{transform_indices = @transform_0, window_bounds = array<i64: 8, 32>}, {transform_indices = @transform_1, window_bounds = array<i64: 8, 32>}, {pipeline_mode = #tpu.pipeline_mode<synchronous>, transform_indices = @transform_2, window_bounds = array<i64: 64, 128>}, {pipeline_mode = #tpu.pipeline_mode<synchronous>, transform_indices = @transform_3, window_bounds = array<i64: 1, 128>}, {transform_indices = @transform_4, window_bounds = array<i64: 8, 32>}]} {
    %c0 = arith.constant 0 : index
    %c0_0 = arith.constant 0 : index
    %0 = vector.load %arg1[%c0, %c0_0] : memref<8x32xf32, #tpu.memory_space<vmem>>, vector<8x32xf32>
    %cst = arith.constant 0.000000e+00 : f32
    %1 = vector.broadcast %cst : f32 to vector<8x32xf32>
    %2 = arith.maximumf %0, %1 : vector<8x32xf32>
    %c0_1 = arith.constant 0 : index
    %c0_2 = arith.constant 0 : index
    %3 = vector.load %arg2[%c0_1, %c0_2] : memref<8x32xf32, #tpu.memory_space<vmem>>, vector<8x32xf32>
    %cst_3 = arith.constant 0.000000e+00 : f32
    %4 = vector.broadcast %cst_3 : f32 to vector<8x32xf32>
    %5 = arith.maximumf %3, %4 : vector<8x32xf32>
    %6 = tpu.concatenate %2, %5 in 1 : vector<8x32xf32>, vector<8x32xf32> -> vector<8x64xf32>
    %c0_4 = arith.constant 0 : index
    %c0_5 = arith.constant 0 : index
    %7 = vector.load %arg3[%c0_4, %c0_5] : memref<64x128xf32, #tpu.memory_space<vmem>>, vector<64x128xf32>
    %cst_6 = arith.constant dense<0.000000e+00> : vector<8x128xf32>
    %8 = tpu.matmul %6, %7, %cst_6 {dimension_numbers = #tpu.dot_dimension_numbers<[1], [0], [0], [1], [0, 0, 1, 1], [], []>} : vector<8x64xf32>, vector<64x128xf32>, vector<8x128xf32> -> vector<8x128xf32>
    %c0_7 = arith.constant 0 : index
    %c0_8 = arith.constant 0 : index
    %9 = vector.load %arg4[%c0_7, %c0_8] : memref<1x128xf32, #tpu.memory_space<vmem>>, vector<1x128xf32>
    %10 = vector.broadcast %9 : vector<1x128xf32> to vector<8x128xf32>
    %11 = arith.addf %8, %10 : vector<8x128xf32>
    %12 = arith.negf %11 : vector<8x128xf32>
    %13 = math.exp %12 : vector<8x128xf32>
    %cst_9 = arith.constant 1.000000e+00 : f32
    %14 = vector.broadcast %cst_9 : f32 to vector<8x128xf32>
    %15 = arith.addf %14, %13 : vector<8x128xf32>
    %16 = arith.divf %14, %15 : vector<8x128xf32>
    %cst_10 = arith.constant dense<0.000000e+00> : vector<8xf32>
    %17 = vector.multi_reduction <add>, %16, %cst_10 [1] : vector<8x128xf32> to vector<8xf32>
    %18 = vector.shape_cast %17 : vector<8xf32> to vector<8x1xf32>
    %cst_11 = arith.constant 7.812500e-03 : f32
    %19 = vector.broadcast %cst_11 : f32 to vector<8x1xf32>
    %20 = arith.mulf %18, %19 : vector<8x1xf32>
    %c0_12 = arith.constant 0 : index
    %c0_13 = arith.constant 0 : index
    %21 = vector.load %arg2[%c0_12, %c0_13] : memref<8x32xf32, #tpu.memory_space<vmem>>, vector<8x32xf32>
    %22 = vector.broadcast %20 : vector<8x1xf32> to vector<8x32xf32>
    %23 = arith.mulf %21, %22 : vector<8x32xf32>
    %c0_14 = arith.constant 0 : index
    %c0_15 = arith.constant 0 : index
    %24 = vector.load %arg5[%c0_14, %c0_15] : memref<8x32xf32, #tpu.memory_space<vmem>>, vector<8x32xf32>
    tpu.vector_store %arg5[%c0_14, %c0_15], %23 {strides = array<i32>} : memref<8x32xf32, #tpu.memory_space<vmem>>, vector<8x32xf32>,
    return
  }
  func.func @transform_0(%arg0: i32) -> (i32, i32) {
    %c0_i32 = arith.constant 0 : i32
    %c0_i32_0 = arith.constant 0 : i32
    return %arg0, %c0_i32 : i32, i32
  }
  func.func @transform_1(%arg0: i32) -> (i32, i32) {
    %c0_i32 = arith.constant 0 : i32
    %c0_i32_0 = arith.constant 0 : i32
    return %arg0, %c0_i32 : i32, i32
  }
  func.func @transform_2(%arg0: i32) -> (i32, i32) {
    %c0_i32 = arith.constant 0 : i32
    %c0_i32_0 = arith.constant 0 : i32
    %c0_i32_1 = arith.constant 0 : i32
    return %c0_i32, %c0_i32_0 : i32, i32
  }
  func.func @transform_3(%arg0: i32) -> (i32, i32) {
    %c0_i32 = arith.constant 0 : i32
    %c0_i32_0 = arith.constant 0 : i32
    %c0_i32_1 = arith.constant 0 : i32
    return %c0_i32, %c0_i32_0 : i32, i32
  }
  func.func @transform_4(%arg0: i32) -> (i32, i32) {
    %c0_i32 = arith.constant 0 : i32
    %c0_i32_0 = arith.constant 0 : i32
    return %arg0, %c0_i32 : i32, i32
  }
}

</mosaic_0001>

<bundles_post_ra>
// kernel: tpu_custom_call.1
= control target key start
LH: loop header
LB: loop body
LE: loop exit
PB: predicated region body
PF: predicated region fallthrough
CT: control target
= control target key end

     0   :  { %9 = vsyncpa [#allocation3], 0  ;;  %s420_s0 = inlined_call_operand.hbm [shape: f32[8,32], index: 0, kind: input, shape index: {}]   ;;  %s421_s1 = inlined_call_operand.hbm [shape: f32[8,32], index: 1, kind: input, shape index: {}]   ;;  %s422_s2 = inlined_call_operand.hbm [shape: f32[64,128], index: 2, kind: input, shape index: {}]   ;;  %s423_s3 = inlined_call_operand.vmem [shape: f32[1,128], index: 3, kind: input, shape index: {}]   ;;  %s424_s4 = inlined_call_operand.hbm [shape: f32[8,32], index: 4, kind: output, shape index: {}]  }
   0x1   :  { %10 = vsyncpa [#allocation6], 0 }
   0x2   :  { %11 = vsyncpa [#allocation4], 0  ;;  %s332_s15 = smov [#allocation5]   ;;  %s333_s17 = smov [#allocation2]  }
   0x3   :  { %s28_s16 = sshll.u32 %s332_s15, 4  ;;  %s18_s18 = sshll.u32 %s333_s17, 4  ;;  %s29_s16 = int_to_ptr.vmem [resolvable:$true] %s28_s16  ;;  %s19_s18 = int_to_ptr.vmem [resolvable:$true] %s18_s18 }
   0x4   :  { %s238_s21 = scalar_lea.hbm %s421_s1, 128 }
   0x5   :  { %p239_p0 = scmp.ne.s32.totalorder %s421_s1, %s238_s21  ;;  %p242_p1 = scmp.lt.u32.totalorder %s238_s21, %s421_s1 }
   0x7   :  { %p244_p2 = pnand %p242_p1, %p239_p0 }
   0x9   :  { %247 = shalt.err (!%p244_p2)
}
   0xa   :  { %s248_s26 = scalar_lea.vmem %s29_s16, 128  ;;  %p253_p4 = scmp.lt.s32.totalorder %s29_s16, %s29_s16 }
   0xb   :  { %p249_p3 = scmp.ne.s32.totalorder %s29_s16, %s248_s26  ;;  %p254_p5 = scmp.lt.s32.totalorder %s248_s26, %s248_s26 }
   0xd   :  { %p255_p6 = por %p254_p5, %p253_p4 }
   0xf   :  { %p256_p7 = pnand %p255_p6, %p249_p3 }
  0x11   :  { %259 = shalt.err (!%p256_p7)
}
  0x12   :  { %31 = dma.hbm_to_vmem [thread:$0]  %s421_s1, 128, %s29_s16, [#allocation6]  }
  0x13   :  { %s260_s5 = scalar_lea.hbm %s420_s0, 128 }
  0x14   :  { %p261_p8 = scmp.ne.s32.totalorder %s420_s0, %s260_s5  ;;  %p264_p9 = scmp.lt.u32.totalorder %s260_s5, %s420_s0 }
  0x16   :  { %p266_p10 = pnand %p264_p9, %p261_p8 }
  0x18   :  { %269 = shalt.err (!%p266_p10)
}
  0x19   :  { %s270_s10 = scalar_lea.vmem %s19_s18, 128  ;;  %p275_p12 = scmp.lt.s32.totalorder %s19_s18, %s19_s18 }
  0x1a   :  { %p271_p11 = scmp.ne.s32.totalorder %s19_s18, %s270_s10  ;;  %p276_p13 = scmp.lt.s32.totalorder %s270_s10, %s270_s10 }
  0x1c   :  { %p277_p0 = por %p276_p13, %p275_p12 }
  0x1e   :  { %p278_p1 = pnand %p277_p0, %p271_p11 }
  0x20   :  { %281 = shalt.err (!%p278_p1)
}
  0x21   :  { %21 = dma.hbm_to_vmem [thread:$0]  %s420_s0, 128, %s19_s18, [#allocation3]  }
  0x22   :  { %s334_s12 = smov [#allocation7]   ;;  %s282_s16 = scalar_lea.hbm %s422_s2, 1024 }
  0x23   :  { %s37_s13 = sshll.u32 %s334_s12, 4  ;;  %p283_p2 = scmp.ne.s32.totalorder %s422_s2, %s282_s16  ;;  %s38_s13 = int_to_ptr.vmem [resolvable:$true] %s37_s13 }
  0x24   :  { %p286_p3 = scmp.lt.u32.totalorder %s282_s16, %s422_s2 }
  0x26   :  { %p288_p4 = pnand %p286_p3, %p283_p2 }
  0x28   :  { %291 = shalt.err (!%p288_p4)
}
  0x29   :  { %s292_s22 = scalar_lea.vmem %s38_s13, 1024  ;;  %p297_p6 = scmp.lt.s32.totalorder %s38_s13, %s38_s13 }
  0x2a   :  { %p293_p5 = scmp.ne.s32.totalorder %s38_s13, %s292_s22  ;;  %p298_p7 = scmp.lt.s32.totalorder %s292_s22, %s292_s22 }
  0x2c   :  { %p299_p8 = por %p298_p7, %p297_p6 }
  0x2e   :  { %p300_p9 = pnand %p299_p8, %p293_p5 }
  0x30   :  { %303 = shalt.err (!%p300_p9)
}
  0x31   :  { %s335_s0 = smov 128   ;;  %s336_s18 = smov 8  }
  0x32   :  { %43 = dma.hbm_to_vmem [thread:$0]  %s422_s2, 1024, %s38_s13, [#allocation6], %s335_s0, %s335_s0, %s336_s18  }
  0x33   :  { %326 = dma.done.wait [#allocation3], 128  }
  0x34   :  { %327 = vsyncadd [#allocation3], 4294967168 }
  0x35   :  { %328 = dma.done.wait [#allocation6], 1152  }
  0x36   :  { %329 = vsyncadd [#allocation6], 4294966144  ;;  %v337_v0 = vmov 0.0|0.0   ;;  %vm338_vm0 = vmmov 0   ;;  %v339_v1 = vmov 0.0   ;;  %v57_v2 = vld [vmem:[#allocation5] sm:$0xff] }
  0x37   :  { %212 = vmatprep.subr.bf16.mxu0 %v337_v0  ;;  %209 = vmatprep.mubr.msk.f32.mxu0 %vm338_vm0, %v339_v1  ;;  %v65_v3 = vld [vmem:[#allocation7] sm:$0xff]  ;;  %v66_v4 = vld [vmem:[#allocation7 + $0x8] sm:$0xff]  ;;  %v58_v5 = vmax.f32 %v57_v2, 0.0  ;;  %v67_v7 = vld [vmem:[#allocation7 + $0x10] sm:$0xff]  ;;  %s340_s25 = smov 32   ;;  %vm63_vm1 = vcmask 261120  }
  0x38   :  { %v213_v6 = vpack.c.bf16 %v66_v4, %v65_v3  ;;  %v68_v8 = vld [vmem:[#allocation7 + $0x18] sm:$0xff]  ;;  %v69_v10 = vld [vmem:[#allocation7 + $0x20] sm:$0xff]  ;;  %v70_v11 = vld [vmem:[#allocation7 + $0x28] sm:$0xff]  ;;  %vm80_vm2 = vcmask 523264   ;;  %s341_s27 = smov [#allocation8]  }
  0x39   :  { %60 = vrot.lane.b32.xlu0 %v58_v5, %s340_s25  ;;  %v216_v9 = vpack.c.bf16 %v68_v8, %v67_v7  ;;  %v219_v12 = vpack.c.bf16 %v70_v11, %v69_v10  ;;  %v71_v13 = vld [vmem:[#allocation7 + $0x30] sm:$0xff]  ;;  %v72_v14 = vld [vmem:[#allocation7 + $0x38] sm:$0xff]  ;;  %s171_s28 = sshll.u32 %s341_s27, 4  ;;  %s172_s28 = int_to_ptr.vmem [resolvable:$true] %s171_s28 }
  0x3a   :  { %214 = vmatpush3.bf16.msra.mxu0 %v213_v6  ;;  %v222_v15 = vpack.c.bf16 %v72_v14, %v71_v13  ;;  %v55_v16 = vld [vmem:[#allocation2] sm:$0xff]  ;;  %s304_s29 = scalar_lea.vmem %s172_s28, 128  ;;  %p309_p11 = scmp.lt.s32.totalorder %s172_s28, %s172_s28 }
  0x3b   :  { %215 = vmatprep.subr.bf16.mxu0 %v337_v0  ;;  %v56_v17 = vmax.f32 %v55_v16, 0.0  ;;  %v181_v20 = vld [vmem:[%s423_s3] ss:$0 sm:$0xff]  ;;  %p305_p10 = scmp.ne.s32.totalorder %s172_s28, %s304_s29  ;;  %p310_p12 = scmp.lt.s32.totalorder %s304_s29, %s304_s29 }
  0x3d   :  { %p311_p13 = por %p310_p12, %p309_p11 }
  0x3e   :  { %217 = vmatpush3.bf16.msra.mxu0 %v216_v9 }
  0x3f   :  { %218 = vmatprep.subr.bf16.mxu0 %v337_v0  ;;  %p312_p0 = pnand %p311_p13, %p305_p10 }
  0x42   :  { %220 = vmatpush3.bf16.msra.mxu0 %v219_v12 }
  0x43   :  { %221 = vmatprep.subr.bf16.mxu0 %v337_v0 }
  0x46   :  { %223 = vmatpush3.bf16.msra.mxu0 %v222_v15 }
  0xab   :  { %v61_v18 = vpop.permute.xlu0 %60 }
  0xac   :  { %v64_v19 = vsel %vm63_vm1, %v56_v17, %v61_v18 }
  0xad   :  { %210 = vmatmul.mubr.msk.f32.vlgmr.msra.gmra.mrb[0].mxu0 %vm80_vm2, %v64_v19 }
 0x180   :  { %v150_v21 = vpop.f32.mrb[0].mxu0 }
 0x181   :  { %v151_v22 = vadd.f32 %v181_v20, %v150_v21  ;;  %v211_v23 = vpop.f32.mrb[1].mxu0 }
 0x183   :  { %v183_v24 = vmul.f32 -1.442695, %v151_v22 }
 0x185   :  { %234 = vpow2.f32 %v183_v24 }
 0x18f   :  { %v235_v25 = vpop.eup %234 }
 0x190   :  { %v157_v26 = vadd.f32 1.0, %v235_v25 }
 0x192   :  { %236 = vrcp.f32 %v157_v26 }
 0x19c   :  { %v237_v27 = vpop.eup %236 }
 0x19d   :  { %160 = vadd.xlane.f32.xlu0 %v237_v27 }
 0x22a   :  { %v161_v28 = vpop.xlane.xlu0 %160 }
 0x22b   :  { %v162_v29 = vmul.f32 0.0078125, %v161_v28 }
 0x22d   :  { %v163_v30 = vmul.f32 %v162_v29, %v57_v2 }
 0x22f   :  { %164 = vst.msk [vmem:[#allocation8] sm:$0xff] %vm63_vm1, %v163_v30 }
 0x230   :  { %315 = shalt.err (!%p312_p0)
}
 0x231   :  { %s316_s5 = scalar_lea.hbm %s424_s4, 128 }
 0x232   :  { %p317_p1 = scmp.ne.s32.totalorder %s424_s4, %s316_s5  ;;  %p320_p2 = scmp.lt.u32.totalorder %s316_s5, %s424_s4 }
 0x234   :  { %p322_p3 = pnand %p320_p2, %p317_p1 }
 0x236   :  { %325 = shalt.err (!%p322_p3)
}
 0x237   :  { %174 = dma.vmem_to_hbm [thread:$0]  %s172_s28, 128, %s424_s4, [#allocation4]  }
 0x238   :  { %330 = dma.done.wait [#allocation4], 128  }
 0x239   :  { %331 = vsyncadd [#allocation4], 4294967168 }
 0x23a   :  { %178 = vsyncpa [#allocation3], 1 }
 0x23b   :  { %179 = vsyncpa [#allocation6], 1 }
 0x23c   :  { %180 = vsyncpa [#allocation4], 1 }

</bundles_post_ra>
